<compile_context>
chip_gen: v6e
topology: v6e:2x2x1
jax: 0.10.0
libtpu: 0.0.40
codegen_flags: <defaults>
</compile_context>

<pallas_src>
import jax
import jax.numpy as jnp
from jax import lax
from jax.experimental import pallas as pl
from jax.experimental.pallas import tpu as pltpu


def _round_up(x, m):
    return ((x + m - 1) // m) * m


def _fc_nct_kernel(x_ref, w_ref, o_ref):
    """One (batch, time-tile) grid step.

    x_ref: (C, TT)  slab straight out of the NCT activation (no HBM transpose)
    w_ref: (KP, C)  PyTorch-layout weight, K zero-padded to KP (multiple of 8)
    o_ref: (TT, K)  tile of the final (N, T, K) output (K = true num_classes)
    """
    x = x_ref[...]
    if x.dtype != w_ref.dtype:
        # Optional low-precision compute path (e.g. bf16 on v5e); the cast runs
        # on the VPU inside the kernel, so it adds no HBM traffic.
        x = x.astype(w_ref.dtype)
    # Natural MXU orientation: contract W's lane axis with X's sublane axis.
    r = lax.dot_general(
        w_ref[...], x,
        dimension_numbers=(((1,), (0,)), ((), ())),  # (KP,C) @ (C,TT) -> (KP,TT)
        preferred_element_type=jnp.float32,
    )
    # Small XLU transpose of the aligned (KP, TT) result, then store only the K
    # real class columns straight into the (N, T, K) output (masked vst).
    o_ref[...] = jnp.transpose(r)[:, : o_ref.shape[1]].astype(o_ref.dtype)


def _choose_tile_t(T, N, target):
    """Pick a lane-aligned (multiple-of-128) time tile.

    Ragged T is handled by the grid (pl.cdiv): garbage in out-of-bounds time
    columns only affects out-of-bounds output rows, which Pallas masks off.
    """
    tile = min(_round_up(T, 128), max(128, (target // 128) * 128))
    # Keep at least ~8 grid steps so the software pipeline (and v7x's two
    # TensorCores) have work to overlap when N / T are small.
    while tile > 128 and N * pl.cdiv(T, tile) < 8:
        tile = max(128, ((tile // 2) // 128) * 128)
    return tile


def fc_fintune_matmul(x_nct, weight_kc, num_classes=None, *,
                      tile_t=1024, compute_dtype=None, vmem_limit_bytes=None):
    """Linear(C->K, bias=False) over the channel axis of x (N, C, T).

    Returns the (N, T, K) output directly — no padded intermediate, no
    wrapper-side slice, one HBM pass over the output.
    """
    N, C, T = x_nct.shape
    Kw, C2 = weight_kc.shape
    assert C == C2, f"channel mismatch: {C} vs {C2}"
    K = int(num_classes) if num_classes is not None else Kw
    KP = max(8, _round_up(K, 8))  # sublane-pad the class axis only (e.g. 29 -> 32)

    if Kw == KP:
        w = weight_kc
    else:
        w = jnp.zeros((KP, C), dtype=weight_kc.dtype).at[:K, :].set(weight_kc[:K, :])
    # Match the activation dtype (or an explicit low-precision compute dtype).
    w = w.astype(compute_dtype if compute_dtype is not None else x_nct.dtype)

    TT = _choose_tile_t(T, N, tile_t)
    num_t = pl.cdiv(T, TT)
    out_dtype = x_nct.dtype
    out_itemsize = jnp.dtype(out_dtype).itemsize

    cost = pl.CostEstimate(
        flops=2 * N * T * C * KP,
        transcendentals=0,
        bytes_accessed=(x_nct.size * x_nct.dtype.itemsize
                        + w.size * w.dtype.itemsize
                        + N * T * K * out_itemsize),
    )

    return pl.pallas_call(
        _fc_nct_kernel,
        out_shape=jax.ShapeDtypeStruct((N, T, K), out_dtype),
        grid_spec=pltpu.PrefetchScalarGridSpec(
            num_scalar_prefetch=0,
            grid=(N, num_t),
            in_specs=[
                # (1, C, TT) slab of x straight from the NCT layout (batch squeezed).
                pl.BlockSpec((None, C, TT), lambda n, t: (n, 0, t)),
                # Full (KP, C) weight, resident in VMEM across all grid steps.
                pl.BlockSpec((KP, C), lambda n, t: (0, 0)),
            ],
            out_specs=pl.BlockSpec((None, TT, K), lambda n, t: (n, t, 0)),
        ),
        compiler_params=pltpu.CompilerParams(
            dimension_semantics=("parallel", "parallel"),
            vmem_limit_bytes=vmem_limit_bytes,
        ),
        cost_estimate=cost,
    )(x_nct, w)


class FCFintunePallas:
    """JAX/Pallas equivalent of FCFintune (forward only)."""

    def __init__(self, labels, net_arch="base", audio_conf=None,
                 input_channels=512, key=None):
        self.audio_conf = audio_conf
        self.labels = labels
        self.input_channels = input_channels
        self.num_classes = len(labels)
        if key is None:
            key = jax.random.PRNGKey(0)
        # PyTorch nn.Linear default init: U(-1/sqrt(in), 1/sqrt(in)),
        # weight stored PyTorch-style as (out_features, in_features) = (K, C).
        bound = 1.0 / (input_channels ** 0.5)
        self.weight = jax.random.uniform(
            key, (self.num_classes, input_channels),
            minval=-bound, maxval=bound, dtype=jnp.float32,
        )
        # Sublane-pad the class axis ONCE here (not per forward call).
        kp = max(8, _round_up(self.num_classes, 8))
        self.weight_padded = (
            jnp.zeros((kp, input_channels), dtype=jnp.float32)
            .at[: self.num_classes, :].set(self.weight)
        )

    def forward(self, x, lengths, *, tile_t=1024, compute_dtype=None,
                vmem_limit_bytes=None):
        # x: (N, C, T)
        embedding = x
        N, C, T = x.shape
        assert C == self.input_channels
        out = fc_fintune_matmul(
            x, self.weight_padded, self.num_classes,
            tile_t=tile_t, compute_dtype=compute_dtype,
            vmem_limit_bytes=vmem_limit_bytes,
        )                                            # (N, T, K) directly
        lengths_int = lengths.astype(jnp.int32)      # lengths.cpu().int()
        return out, lengths_int, embedding

    # TODO(synk): load_model / serialize_state / get_param_size are host-side
    # checkpoint utilities with no kernel equivalent; not implemented here.


if __name__ == "__main__":
    key = jax.random.PRNGKey(0)
    k_x, k_w, _ = jax.random.split(key, 3)

    # Small but tiling-representative shapes: batch=2, channels=64, time=256,
    # num_classes=29 (ASR char vocab-ish).
    N, C, T = 2, 64, 256
    labels = [str(i) for i in range(29)]

    x = jax.random.normal(k_x, (N, C, T), dtype=jnp.float32)
    lengths = jnp.array([T, T - 37], dtype=jnp.float32)

    model = FCFintunePallas(labels, input_channels=C, key=k_w)
    out, lengths_out, emb = model.forward(x, lengths)
    out = jax.block_until_ready(out)

    # Reference check against plain JAX (same math as the PyTorch forward).
    ref = jnp.einsum("nct,kc->ntk", x, model.weight)
    assert out.shape == (N, T, len(labels))
    assert lengths_out.dtype == jnp.int32
    assert emb.shape == x.shape
    assert jnp.allclose(out, ref, atol=1e-4, rtol=1e-4), float(
        jnp.max(jnp.abs(out - ref))
    )

    print("KERNEL_OK")
</pallas_src>

<mosaic_0001>
module attributes {stable_mosaic.version = 11 : i64} {
  func.func @_fc_nct_kernel(%arg0: i32, %arg1: i32, %arg2: memref<1x64x128xf32, #tpu.memory_space<vmem>>, %arg3: memref<32x64xf32, #tpu.memory_space<vmem>>, %arg4: memref<1x128x29xf32, #tpu.memory_space<vmem>>) attributes {dimension_semantics = [#tpu.dimension_semantics<parallel>, #tpu.dimension_semantics<parallel>], iteration_bounds = array<i64: 2, 2>, scalar_prefetch = 0 : i64, scratch_operands = 0 : i64, tpu.core_type = #tpu.core_type<tc>, window_params = [{transform_indices = @transform_0, window_bounds = array<i64: 1, 64, 128>}, {pipeline_mode = #tpu.pipeline_mode<synchronous>, transform_indices = @transform_1, window_bounds = array<i64: 32, 64>}, {transform_indices = @transform_2, window_bounds = array<i64: 1, 128, 29>}]} {
    %c0 = arith.constant 0 : index
    %c0_0 = arith.constant 0 : index
    %c0_1 = arith.constant 0 : index
    %0 = vector.load %arg2[%c0, %c0_0, %c0_1] : memref<1x64x128xf32, #tpu.memory_space<vmem>>, vector<1x64x128xf32>
    %1 = vector.shape_cast %0 : vector<1x64x128xf32> to vector<64x128xf32>
    %c0_2 = arith.constant 0 : index
    %c0_3 = arith.constant 0 : index
    %2 = vector.load %arg3[%c0_2, %c0_3] : memref<32x64xf32, #tpu.memory_space<vmem>>, vector<32x64xf32>
    %cst = arith.constant dense<0.000000e+00> : vector<32x128xf32>
    %3 = tpu.matmul %2, %1, %cst {dimension_numbers = #tpu.dot_dimension_numbers<[1], [0], [0], [1], [0, 0, 1, 1], [], []>} : vector<32x64xf32>, vector<64x128xf32>, vector<32x128xf32> -> vector<32x128xf32>
    %4 = tpu.transpose %3, [1, 0] : vector<32x128xf32> -> vector<128x32xf32>
    %5 = vector.extract_strided_slice %4 {offsets = [0, 0], sizes = [128, 29], strides = [1, 1]} : vector<128x32xf32> to vector<128x29xf32>
    %c0_4 = arith.constant 0 : index
    %c0_5 = arith.constant 0 : index
    %c0_6 = arith.constant 0 : index
    %6 = vector.load %arg4[%c0_4, %c0_5, %c0_6] : memref<1x128x29xf32, #tpu.memory_space<vmem>>, vector<1x128x29xf32>
    %7 = vector.shape_cast %6 : vector<1x128x29xf32> to vector<128x29xf32>
    %8 = vector.shape_cast %5 : vector<128x29xf32> to vector<1x128x29xf32>
    tpu.vector_store %arg4[%c0_4, %c0_5, %c0_6], %8 {strides = array<i32>} : memref<1x128x29xf32, #tpu.memory_space<vmem>>, vector<1x128x29xf32>,
    return
  }
  func.func @transform_0(%arg0: i32, %arg1: i32) -> (i32, i32, i32) {
    %c0_i32 = arith.constant 0 : i32
    %c0_i32_0 = arith.constant 0 : i32
    return %arg0, %c0_i32, %arg1 : i32, i32, i32
  }
  func.func @transform_1(%arg0: i32, %arg1: i32) -> (i32, i32) {
    %c0_i32 = arith.constant 0 : i32
    %c0_i32_0 = arith.constant 0 : i32
    %c0_i32_1 = arith.constant 0 : i32
    return %c0_i32, %c0_i32_0 : i32, i32
  }
  func.func @transform_2(%arg0: i32, %arg1: i32) -> (i32, i32, i32) {
    %c0_i32 = arith.constant 0 : i32
    %c0_i32_0 = arith.constant 0 : i32
    return %arg0, %arg1, %c0_i32 : i32, i32, i32
  }
}

</mosaic_0001>

<bundles_post_ra>
// kernel: tpu_custom_call.1
= control target key start
LH: loop header
LB: loop body
LE: loop exit
PB: predicated region body
PF: predicated region fallthrough
CT: control target
= control target key end

     0   :  { %7 = vsyncpa [#allocation3], 0  ;;  %s974_s0 = inlined_call_operand.hbm [shape: f32[2,64,256], index: 0, kind: input, shape index: {}]   ;;  %s975_s1 = inlined_call_operand.hbm [shape: f32[32,64], index: 1, kind: input, shape index: {}]   ;;  %s976_s2 = inlined_call_operand.vmem [shape: f32[2,256,29], index: 2, kind: output, shape index: {}]  }
   0x1   :  { %9 = vsyncpa [#allocation3 + $0x1], 0 }
   0x2   :  { %10 = vsyncpa [#allocation5], 0  ;;  %s773_s9 = smov 0   ;;  %s775_s10 = smov 0  }
   0x3   :  { %s777_s11 = smov 0   ;;  %s779_s12 = smov 0  }
   0x4   :  { %s781_s13 = smov 0   ;;  %s783_s14 = smov 0  }
   0x5   :  { %s785_s15 = smov 0   ;;  %s787_s16 = smov 0  }
   0x6 LB: > { %s471_s17 = sadd.s32 4294967295, %s751_s16   ;;  %p44_p0 = scmp.ne.s32.totalorder %s731_s11, %s727_s10  ;;  %s751_s16 = sphi %s787_s16, %s16_s16   ;;  %s747_s15 = sphi %s785_s15, %s997_s15   ;;  %s743_s14 = sphi %s783_s14, %s996_s14   ;;  %s739_s13 = sphi %s781_s13, %s995_s13   ;;  %s735_s12 = sphi %s779_s12, %s994_s12   ;;  %s731_s11 = sphi %s777_s11, %s993_s11   ;;  %s727_s10 = sphi %s775_s10, %s992_s10   ;;  %s723_s9 = sphi %s773_s9, %s991_s9  }
   0x7   : > { %p45_p1 = scmp.eq.s32.totalorder %s751_s16, 0  ;;  %p50_p2 = scmp.ne.s32.totalorder %s727_s10, %s723_s9 }
   0x8   : > { %p817_p3 = scmp.eq.s32.totalorder %s471_s17, 0  ;;  %p473_p5 = scmp.ge.s32.totalorder %s751_s16, 1 }
   0x9   : > { %p46_p4 = por %p45_p1, %p44_p0  ;;  %p110_p7 = scmp.lt.s32.totalorder %s751_s16, 5 }
   0xa   : > { %p824_p6 = por %p817_p3, %p50_p2  ;;  %s753_s22 = smov [#allocation4]  }
   0xb   : > { %p829_p8 = pnand %p473_p5, %p110_p7  ;;  %s122_s23 = sshll.u32 %s753_s22, 4  ;;  %s123_s23 = int_to_ptr.vmem [resolvable:$true] %s122_s23 }
   0xc   : > { %s982_s20 = scalar_select %p824_p6, 1, 0 }
   0xd   : > { %s983_s21 = scalar_select %p829_p8, 1, 0 }
   0xe   : > { %p547_p9 = pneg %p829_p8  ;;  %p556_p10 = scmp.lt.s32.totalorder %s751_s16, 4 }
   0xf   : > { %s638_s26 = scalar_lea.vmem %s123_s23, 512  ;;  %p646_p5 = scmp.lt.s32.totalorder %s123_s23, %s123_s23 }
  0x10   : > { %p838_p11 = pnand %p547_p9, %p817_p3  ;;  %p842_p12 = pnand %p556_p10, %p46_p4 }
  0x11   : > { %p639_p0 = scmp.ne.s32.totalorder %s123_s23, %s638_s26  ;;  %p647_p7 = scmp.lt.s32.totalorder %s638_s26, %s638_s26 }
  0x12   : > { %p629_p13 = pneg %p838_p11 }
  0x13   : > { %p648_p6 = por %p647_p7, %p646_p5 }
  0x14   : > { %p641_p1 = pnand %p639_p0, %p629_p13 }
  0x16   : > { %p642_p2 = pneg %p641_p1 }
  0x18   : > { %p649_p8 = pnand %p648_p6, %p642_p2 }
  0x1a   : > { %652 = shalt.err (!%p649_p8)
}
  0x1b   : > { %s979_s27 = smov 128   ;;  %s980_s28 = smov 8  }
  0x1c   : > { %550 = dma.hbm_to_vmem [thread:$0]  (!%p838_p11), %s975_s1, 512, %s123_s23, [#allocation5], %s979_s27, %s979_s27, %s980_s28  }
  0x1d   : > { %s25_s3 = sadd.s32 1, %s743_s14  ;;  %s28_s4 = sadd.s32 1, %s747_s15 }
  0x1e   : > { %p26_p4 = scmp.ge.s32.totalorder %s25_s3, 2  ;;  %s136_s5 = sand.u32 1, %s731_s11  }
  0x1f   : > { %s476_s6 = sshll.u32 %s136_s5, 6  ;;  %s477_s8 = sshll.u32 %s747_s15, 4 }
  0x20   : > { %s999_s3 = smov (%p26_p4, %s25_s3), 0  ;;  %s1001_s4 = smov (!%p26_p4, %s28_s4), %s747_s15 }
  0x21   : > { %s33_s7 = ssub.s32 %s743_s14, %s999_s3  ;;  %p30_p6 = scmp.ge.s32.totalorder %s1001_s4, 2 }
  0x22   : > { %s145_s9 = sadd.s32 %s743_s14, %s477_s8  ;;  %s140_s17 = scalar_lea.vmem [#allocation2], %s476_s6 }
  0x23   : > { %s148_s22 = sshll.u32 %s140_s17, 4  ;;  %s1003_s4 = smov (%p30_p6, %s1001_s4), 0  ;;  %s149_s22 = int_to_ptr.vmem [resolvable:$true] %s148_s22 }
  0x24   : > { %s478_s23 = sshll.u32 %s145_s9, 7  ;;  %s32_s24 = ssub.s32 %s747_s15, %s1003_s4 }
  0x25   : > { %s147_s30 = scalar_lea.hbm %s974_s0, %s478_s23  ;;  %s34_s18 = sor.u32 %s33_s7, %s32_s24 }
  0x26   : > { %p35_p8 = scmp.eq.s32.totalorder %s34_s18, 0  ;;  %s137_s27 = scalar_lea.sflag [#allocation3], %s136_s5 }
  0x27   : > { %p655_p9 = pneg %p842_p12  ;;  %s666_s28 = scalar_lea.vmem %s149_s22, 1024 }
  0x28   : > { %p667_p10 = scmp.ne.s32.totalorder %s149_s22, %s666_s28  ;;  %s756_s6 = smov [#allocation2]  }
  0x29   : > { %s671_s8 = sshll.u32 %s756_s6, 4  ;;  %s672_s8 = int_to_ptr.vmem [resolvable:$false] %s671_s8 }
  0x2a   : > { %p669_p11 = pnand %p667_p10, %p655_p9  ;;  %s673_s17 = scalar_lea.vmem %s672_s8, 2048 }
  0x2b   : > { %p674_p0 = scmp.lt.s32.totalorder %s149_s22, %s672_s8  ;;  %p675_p1 = scmp.lt.s32.totalorder %s673_s17, %s666_s28 }
  0x2c   : > { %p670_p13 = pneg %p669_p11 }
  0x2d   : > { %p676_p2 = por %p675_p1, %p674_p0 }
  0x2f   : > { %p677_p5 = pnand %p676_p2, %p670_p13 }
  0x31   : > { %680 = shalt.err (!%p677_p5)
}
  0x32   : > { %s757_s9 = smov 256   ;;  %s986_s7 = smov 8  }
  0x33   : > { %s987_s5 = smov 128   ;;  %s988_s23 = sadd.s32 1, %s731_s11 }
  0x34   : > { %554 = dma.hbm_to_vmem [thread:$0]  (!%p842_p12), %s147_s30, 1024, %s149_s22, %s137_s27, %s757_s9, %s987_s5, %s986_s7  }
  0x35   : > { %s883_s24 = scalar_select %p35_p8, %s731_s11, %s988_s23  }
  0x36   : > { %p989_p7 = scmp.ne.s32.totalorder %s983_s21, 0 }
  0x37   : > { %s162_s28 = sand.u32 (!%p989_p7), 1, %s727_s10   ;;  %p990_p4 = scmp.ne.s32.totalorder (!%p989_p7), %s982_s20, 0 }
  0x38   : > { %160 = sbr.rel (%p989_p7) target bundleno = 462 (0x1ce), region = 28  ;;  %s480_s26 = sshll.u32 (!%p989_p7), %s162_s28, 6 }
  0x39   : > { %s163_s29 = scalar_lea.sflag (!%p989_p7), [#allocation3], %s162_s28  ;;  %s888_s6 = scalar_lea.vmem (!%p989_p7), [#allocation2], %s480_s26 }
  0x3d   : > { %714 = dma.done.wait (%p990_p4), %s163_s29, 1024  }
  0x3e   : > { %716 = vsyncadd (%p990_p4), %s163_s29, 4294966272 }
  0x3f   : > { %718 = dma.done.wait (%p817_p3), [#allocation5], 512  }
  0x40   : > { %720 = vsyncadd (%p817_p3), [#allocation5], 4294966784  ;;  %v212_v0 = vld [vmem:[%s888_s6 + $0x38] sm:$0xff]  ;;  %v211_v1 = vld [vmem:[%s888_s6 + $0x30] sm:$0xff]  ;;  %vm217_vm0 = vcmask 523264   ;;  %s482_s18 = sshll.u32 %s735_s12, 4 }
  0x41   : > { %503 = vmatprep.subr.mxu0 %v212_v0  ;;  %525 = vmatprep.subr.mxu1 %v212_v0  ;;  %v210_v2 = vld [vmem:[%s888_s6 + $0x28] sm:$0xff]  ;;  %v209_v3 = vld [vmem:[%s888_s6 + $0x20] sm:$0xff]  ;;  %v208_v4 = vld [vmem:[%s888_s6 + $0x18] sm:$0xff]  ;;  %p196_p3 = scmp.lt.s32.totalorder %s739_s13, 1  ;;  %p198_p12 = scmp.lt.s32.totalorder %s482_s18, 31  ;;  %vm347_vm1 = vcmask 236544  }
  0x42   : > { %504 = vmatpush3.msra.mxu0 %v212_v0  ;;  %533 = vmatpush3.msra.mxu1 %v212_v0  ;;  %v207_v5 = vld [vmem:[%s888_s6 + $0x10] sm:$0xff]  ;;  %v213_v6 = vld [vmem:[#allocation4] sm:$0xff]  ;;  %v206_v7 = vld [vmem:[%s888_s6 + $0x8] sm:$0xff] }
  0x43   : > { %505 = vmatprep.subr.mxu0 %v211_v1  ;;  %526 = vmatprep.subr.mxu1 %v211_v1  ;;  %v205_v8 = vld [vmem:[%s888_s6] sm:$0xff]  ;;  %v214_v9 = vld [vmem:[#allocation4 + $0x8] sm:$0xff]  ;;  %v215_v10 = vld [vmem:[#allocation4 + $0x10] sm:$0xff]  ;;  %s1005_s13 = smov (!%p196_p3, %s739_s13), 1  ;;  %s1007_s18 = smov (!%p198_p12, %s482_s18), 31 }
  0x44   : > { %506 = vmatpush3.msra.mxu0 %v211_v1  ;;  %534 = vmatpush3.msra.mxu1 %v211_v1  ;;  %v216_v11 = vld [vmem:[#allocation4 + $0x18] sm:$0xff]  ;;  %s483_s19 = sshll.u32 %s1005_s13, 5 }
  0x45   : > { %507 = vmatprep.subr.mxu0 %v210_v2  ;;  %527 = vmatprep.subr.mxu1 %v210_v2  ;;  %s201_s20 = sadd.s32 %s483_s19, %s1007_s18 }
  0x46   : > { %508 = vmatpush3.msra.mxu0 %v210_v2  ;;  %535 = vmatpush3.msra.mxu1 %v210_v2  ;;  %s484_s21 = sshll.u32 %s201_s20, 3 }
  0x47   : > { %509 = vmatprep.subr.mxu0 %v209_v3  ;;  %528 = vmatprep.subr.mxu1 %v209_v3  ;;  %s916_s22 = scalar_lea.vmem %s976_s2, %s484_s21 }
  0x48   : > { %510 = vmatpush3.msra.mxu0 %v209_v3  ;;  %536 = vmatpush3.msra.mxu1 %v209_v3 }
  0x49   : > { %511 = vmatprep.subr.mxu0 %v208_v4  ;;  %529 = vmatprep.subr.mxu1 %v208_v4 }
  0x4a   : > { %512 = vmatpush3.msra.mxu0 %v208_v4  ;;  %537 = vmatpush3.msra.mxu1 %v208_v4 }
  0x4b   : > { %513 = vmatprep.subr.mxu0 %v207_v5  ;;  %519 = vmatprep.mubr.msk.f32.mxu0 %vm217_vm0, %v213_v6 }
  0x4c   : > { %514 = vmatpush3.msra.mxu0 %v207_v5  ;;  %530 = vmatprep.subr.mxu1 %v207_v5 }
  0x4d   : > { %515 = vmatprep.subr.mxu0 %v206_v7  ;;  %538 = vmatpush3.msra.mxu1 %v207_v5 }
  0x4e   : > { %516 = vmatpush3.msra.mxu0 %v206_v7  ;;  %531 = vmatprep.subr.mxu1 %v206_v7 }
  0x4f   : > { %517 = vmatprep.subr.mxu0 %v205_v8  ;;  %539 = vmatpush3.msra.mxu1 %v206_v7 }
  0x50   : > { %518 = vmatpush3.msra.mxu0 %v205_v8  ;;  %532 = vmatprep.subr.mxu1 %v205_v8 }
  0x51   : > { %520 = vmatmul.mubr.msk.f32.vlgmr.msra.gmra.mxu0 %vm217_vm0, %v214_v9  ;;  %540 = vmatpush3.msra.mxu1 %v205_v8 }
  0x52   : > { %522 = vmatprep.mubr.msk.f32.mxu1 %vm217_vm0, %v215_v10 }
  0x53   : > { %523 = vmatmul.mubr.msk.f32.vlgmr.msra.gmra.mxu1 %vm217_vm0, %v216_v11 }
 0x111   : > { %v521_v12 = vpop.f32.mrf.mxu0 }
 0x113   : > { %v296_v13 = vpop.f32.mrf.mxu0  ;;  %v524_v14 = vpop.f32.mrf.mxu1 }
 0x114   : > { %315 = vxpose.xlu0.b32.start [1/4] (short) %v296_v13, 128 }
 0x115   : > { %v306_v15 = vpop.f32.mrf.mxu1 }
 0x118   : > { %316 = vxpose.xlu0.b32.cont [2/4] (short) %v521_v12, 128 }
 0x11c   : > { %317 = vxpose.xlu0.b32.cont [3/4] (short) %v306_v15, 128 }
 0x120   : > { %318 = vxpose.xlu0.b32.end [4/4] (short) %v524_v14, 128 }
 0x190   : > { %v331_v16 = vpop.trf.xlu0 }
 0x191   : > { %348 = vst.msk [vmem:[%s916_s22] sm:$0xff] %vm347_vm1, %v331_v16 }
 0x194   : > { %v332_v17 = vpop.trf.xlu0 }
 0x195   : > { %349 = vst.msk [vmem:[%s916_s22 + $0x8] sm:$0xff] %vm347_vm1, %v332_v17 }
 0x198   : > { %v333_v18 = vpop.trf.xlu0 }
 0x199   : > { %350 = vst.msk [vmem:[%s916_s22 + $0x10] sm:$0xff] %vm347_vm1, %v333_v18 }
 0x19c   : > { %v334_v19 = vpop.trf.xlu0 }
 0x19d   : > { %351 = vst.msk [vmem:[%s916_s22 + $0x18] sm:$0xff] %vm347_vm1, %v334_v19 }
 0x1a0   : > { %v335_v20 = vpop.trf.xlu0 }
 0x1a1   : > { %352 = vst.msk [vmem:[%s916_s22 + $0x20] sm:$0xff] %vm347_vm1, %v335_v20 }
 0x1a4   : > { %v336_v21 = vpop.trf.xlu0 }
 0x1a5   : > { %353 = vst.msk [vmem:[%s916_s22 + $0x28] sm:$0xff] %vm347_vm1, %v336_v21 }
 0x1a8   : > { %v337_v22 = vpop.trf.xlu0 }
 0x1a9   : > { %354 = vst.msk [vmem:[%s916_s22 + $0x30] sm:$0xff] %vm347_vm1, %v337_v22 }
 0x1ac   : > { %v338_v23 = vpop.trf.xlu0 }
 0x1ad   : > { %355 = vst.msk [vmem:[%s916_s22 + $0x38] sm:$0xff] %vm347_vm1, %v338_v23 }
 0x1b0   : > { %v339_v24 = vpop.trf.xlu0 }
 0x1b1   : > { %356 = vst.msk [vmem:[%s916_s22 + $0x40] sm:$0xff] %vm347_vm1, %v339_v24 }
 0x1b4   : > { %v340_v25 = vpop.trf.xlu0 }
 0x1b5   : > { %357 = vst.msk [vmem:[%s916_s22 + $0x48] sm:$0xff] %vm347_vm1, %v340_v25 }
 0x1b8   : > { %v341_v26 = vpop.trf.xlu0 }
 0x1b9   : > { %358 = vst.msk [vmem:[%s916_s22 + $0x50] sm:$0xff] %vm347_vm1, %v341_v26 }
 0x1bc   : > { %v342_v27 = vpop.trf.xlu0 }
 0x1bd   : > { %359 = vst.msk [vmem:[%s916_s22 + $0x58] sm:$0xff] %vm347_vm1, %v342_v27 }
 0x1c0   : > { %v343_v28 = vpop.trf.xlu0 }
 0x1c1   : > { %360 = vst.msk [vmem:[%s916_s22 + $0x60] sm:$0xff] %vm347_vm1, %v343_v28 }
 0x1c4   : > { %v344_v29 = vpop.trf.xlu0 }
 0x1c5   : > { %361 = vst.msk [vmem:[%s916_s22 + $0x68] sm:$0xff] %vm347_vm1, %v344_v29 }
 0x1c8   : > { %v345_v30 = vpop.trf.xlu0 }
 0x1c9   : > { %362 = vst.msk [vmem:[%s916_s22 + $0x70] sm:$0xff] %vm347_vm1, %v345_v30 }
 0x1cc   : > { %v346_v31 = vpop.trf.xlu0 }
 0x1cd   : > { %363 = vst.msk [vmem:[%s916_s22 + $0x78] sm:$0xff] %vm347_vm1, %v346_v31 }
 0x1ce PF: > { %s16_s16 = sadd.s32 1, %s751_s16   ;;  %s991_s9 = smov %s727_s10 }
 0x1cf   : > { %p13_p6 = scmp.ge.s32.totalorder %s16_s16, 6   ;;  %s992_s10 = smov %s731_s11 }
 0x1d0   : > { %s993_s11 = smov %s883_s24  ;;  %s994_s12 = smov %s743_s14 }
 0x1d1   : > { %s995_s13 = smov %s747_s15  ;;  %s996_s14 = smov %s999_s3 }
 0x1d2   : > { %s997_s15 = smov %s1003_s4  ;;  %15 = sbr.rel (!%p13_p6) target bundleno = 6 (0x6), region = 72 }
 0x1d7   :  { %394 = vsyncpa [#allocation3], 1 }
 0x1d8   :  { %396 = vsyncpa [#allocation3 + $0x1], 1 }
 0x1d9   :  { %397 = vsyncpa [#allocation5], 1 }

</bundles_post_ra>
